<compile_context>
chip_gen: v5e
topology: v5e:2x2
jax: 0.10.0
libtpu: 0.0.40
codegen_flags: <defaults>
</compile_context>

<pallas_src>
import functools
import math

import jax
import jax.numpy as jnp
from jax.experimental import pallas as pl
from jax.experimental.pallas import tpu as pltpu


def _round_up(x: int, m: int) -> int:
    return (x + m - 1) // m * m


def _gcn_lpa_kernel(adj_ref, mask_ref, u_ref, p_ref, deg_ref, b_ref, o_ref, acc_ref):
    """grid = (rows i [parallel], reduction k [arbitrary, last])."""
    k = pl.program_id(1)

    @pl.when(k == 0)
    def _init():
        acc_ref[...] = jnp.zeros_like(acc_ref)

    # Elementwise edge masking (VPU), kept in bf16 for the MXU.
    am = adj_ref[...] * mask_ref[...]                                   # (TM, TK) bf16

    # Per-K-tile fused projection: [x_k | y_k] @ [[W,0],[0,I],[0,0]] = [x_k@W | y_k | 0]
    # -> lane-dense (TK, F_PAD) slab (f32 accumulate on the MXU, re-quantized to bf16).
    z = jnp.dot(u_ref[...], p_ref[...],
                preferred_element_type=jnp.float32).astype(jnp.bfloat16)

    # Aggregation over this K slab (MXU, f32 resident accumulator).
    acc_ref[...] += jnp.dot(am, z, preferred_element_type=jnp.float32)

    @pl.when(k == pl.num_programs(1) - 1)
    def _finalize():
        # Row-wise L1 normalization (degrees precomputed in f32) + bias on the
        # first F_out lanes (bias slab is zero on the y_hat / padding lanes).
        inv_deg = pl.reciprocal(jnp.maximum(deg_ref[...], 1e-12), approx=True)
        o_ref[...] = acc_ref[...] * inv_deg + b_ref[...]


@functools.partial(jax.jit, static_argnames=("norm", "tm", "tk"))
def gcn_lpa_forward(x, adj, y, weight, bias, mask, norm=True, tm=128, tk=128):
    """Returns (output, y_hat) matching GCN_LPA_Layer.forward."""
    n, f_in = x.shape
    f_out = weight.shape[1]
    c = y.shape[1]

    f_pad = _round_up(f_out + c, 128)          # lane-dense output slab width
    k_dim = _round_up(f_in + c, 16)            # bf16-friendly fused input width
    n_pad = _round_up(n, math.lcm(tm, tk))
    pad_n = n_pad - n

    # ----- wrapper-side prep (layout plumbing + exact f32 row degrees) -----
    if norm:
        deg = jnp.sum(jnp.abs(adj * mask), axis=1, keepdims=True)      # f32, exact
        mask_in = mask
    else:
        deg = jnp.ones((n, 1), jnp.float32)                            # no normalization
        mask_in = jnp.ones_like(adj)

    adj_p = jnp.pad(adj, ((0, pad_n), (0, pad_n))).astype(jnp.bfloat16)
    mask_p = jnp.pad(mask_in, ((0, pad_n), (0, pad_n))).astype(jnp.bfloat16)
    deg_p = jnp.pad(deg, ((0, pad_n), (0, 0))).astype(jnp.float32)

    # Fused per-node features u = [x | y | 0]  (padded rows contribute nothing).
    u = jnp.zeros((n, k_dim), jnp.float32)
    u = u.at[:, :f_in].set(x.astype(jnp.float32))
    u = u.at[:, f_in:f_in + c].set(y.astype(jnp.float32))
    u_p = jnp.pad(u, ((0, pad_n), (0, 0))).astype(jnp.bfloat16)

    # Combined projection P = [[W, 0], [0, I_C], [0, 0]]  -> u @ P = [x@W | y | 0].
    proj = jnp.zeros((k_dim, f_pad), jnp.float32)
    proj = proj.at[:f_in, :f_out].set(weight.astype(jnp.float32))
    proj = proj.at[f_in:f_in + c, f_out:f_out + c].set(jnp.eye(c, dtype=jnp.float32))
    proj = proj.astype(jnp.bfloat16)

    # Bias only on the GCN-output lanes; y_hat / padding lanes get +0.
    bias_pad = jnp.zeros((1, f_pad), jnp.float32).at[0, :f_out].set(
        bias.astype(jnp.float32))

    grid = (n_pad // tm, n_pad // tk)

    grid_spec = pltpu.PrefetchScalarGridSpec(
        num_scalar_prefetch=0,
        grid=grid,
        in_specs=[
            pl.BlockSpec((tm, tk), lambda i, k: (i, k)),           # adj   (bf16)
            pl.BlockSpec((tm, tk), lambda i, k: (i, k)),           # mask  (bf16)
            pl.BlockSpec((tk, k_dim), lambda i, k: (k, 0)),        # [x|y] (bf16)
            pl.BlockSpec((k_dim, f_pad), lambda i, k: (0, 0)),     # projection P
            pl.BlockSpec((tm, 1), lambda i, k: (i, 0)),            # row degrees (f32)
            pl.BlockSpec((1, f_pad), lambda i, k: (0, 0)),         # padded bias (f32)
        ],
        out_specs=pl.BlockSpec((tm, f_pad), lambda i, k: (i, 0)),  # lane-dense slab
        scratch_shapes=[pltpu.VMEM((tm, f_pad), jnp.float32)],     # resident accumulator
    )

    out_pad = pl.pallas_call(
        _gcn_lpa_kernel,
        out_shape=jax.ShapeDtypeStruct((n_pad, f_pad), jnp.float32),
        grid_spec=grid_spec,
        compiler_params=pltpu.CompilerParams(
            dimension_semantics=("parallel", "arbitrary"),
            vmem_limit_bytes=32 * 1024 * 1024,   # raise (v6e) / keep <64 MiB (v7x) for big tiles
        ),
    )(adj_p, mask_p, u_p, proj, deg_p, bias_pad)

    output = out_pad[:n, :f_out]
    y_hat = out_pad[:n, f_out:f_out + c]
    return output, y_hat


def gcn_lpa_reference(x, adj, y, weight, bias, mask, norm=True):
    """Pure-JAX f32 reference of GCN_LPA_Layer.forward."""
    if norm:
        a = adj * mask
        denom = jnp.maximum(jnp.sum(jnp.abs(a), axis=1, keepdims=True), 1e-12)
        a = a / denom
    else:
        a = adj
    output = a @ (x @ weight) + bias[None, :]
    y_hat = a @ y
    return output, y_hat


if __name__ == "__main__":
    # Small deterministic problem: N=256 nodes, 32 in-features, 16 out-features, 8 classes.
    N, IN_F, OUT_F, NUM_CLASSES = 256, 32, 16, 8
    key = jax.random.PRNGKey(0)
    k_x, k_a, k_w, k_b, k_y = jax.random.split(key, 5)

    x = jax.random.normal(k_x, (N, IN_F), dtype=jnp.float32)

    # Dense non-negative adjacency + self-loops so every row degree is > 0.
    a = jax.random.uniform(k_a, (N, N), dtype=jnp.float32)
    adj = jnp.where(a > 0.7, a, 0.0) + jnp.eye(N, dtype=jnp.float32)
    mask = adj                       # GCN_LPA_Layer.__init__: self.mask = adj.clone()

    # Parameters, initialized like reset_parameters(): U(-stdv, stdv), stdv = 1/sqrt(out).
    stdv = 1.0 / (OUT_F ** 0.5)
    weight = jax.random.uniform(k_w, (IN_F, OUT_F), dtype=jnp.float32,
                                minval=-stdv, maxval=stdv)
    bias = jax.random.uniform(k_b, (OUT_F,), dtype=jnp.float32,
                              minval=-stdv, maxval=stdv)

    # Label matrix for the LPA branch (one-hot).
    labels = jax.random.randint(k_y, (N,), 0, NUM_CLASSES)
    y = jax.nn.one_hot(labels, NUM_CLASSES, dtype=jnp.float32)

    # norm=True (module default): full numerical check vs f32 reference
    # (bf16 MXU inputs with f32 accumulation -> loose-ish tolerance).
    out, y_hat = gcn_lpa_forward(x, adj, y, weight, bias, mask, norm=True)
    out, y_hat = jax.block_until_ready((out, y_hat))
    ref_out, ref_yhat = gcn_lpa_reference(x, adj, y, weight, bias, mask, norm=True)

    assert out.shape == (N, OUT_F) and y_hat.shape == (N, NUM_CLASSES)
    assert jnp.allclose(out, ref_out, atol=1e-2, rtol=1e-2), "output mismatch vs reference"
    assert jnp.allclose(y_hat, ref_yhat, atol=1e-2, rtol=1e-2), "y_hat mismatch vs reference"

    # norm=False path: smoke check (raw adjacency aggregation).
    out2, y_hat2 = gcn_lpa_forward(x, adj, y, weight, bias, mask, norm=False)
    out2, y_hat2 = jax.block_until_ready((out2, y_hat2))
    assert out2.shape == (N, OUT_F) and y_hat2.shape == (N, NUM_CLASSES)
    assert bool(jnp.all(jnp.isfinite(out2))) and bool(jnp.all(jnp.isfinite(y_hat2)))

    print("KERNEL_OK")
</pallas_src>

<mosaic_0001>
module attributes {stable_mosaic.version = 11 : i64} {
  func.func @_gcn_lpa_kernel(%arg0: i32, %arg1: i32, %arg2: memref<128x128xbf16, #tpu.memory_space<vmem>>, %arg3: memref<128x128xbf16, #tpu.memory_space<vmem>>, %arg4: memref<128x48xbf16, #tpu.memory_space<vmem>>, %arg5: memref<48x128xbf16, #tpu.memory_space<vmem>>, %arg6: memref<128x1xf32, #tpu.memory_space<vmem>>, %arg7: memref<1x128xf32, #tpu.memory_space<vmem>>, %arg8: memref<128x128xf32, #tpu.memory_space<vmem>>, %arg9: memref<128x128xf32, #tpu.memory_space<vmem>>) attributes {dimension_semantics = [#tpu.dimension_semantics<parallel>, #tpu.dimension_semantics<arbitrary>], iteration_bounds = array<i64: 2, 2>, scalar_prefetch = 0 : i64, scratch_operands = 1 : i64, tpu.core_type = #tpu.core_type<tc>, window_params = [{transform_indices = @transform_0, window_bounds = array<i64: 128, 128>}, {transform_indices = @transform_1, window_bounds = array<i64: 128, 128>}, {transform_indices = @transform_2, window_bounds = array<i64: 128, 48>}, {pipeline_mode = #tpu.pipeline_mode<synchronous>, transform_indices = @transform_3, window_bounds = array<i64: 48, 128>}, {transform_indices = @transform_4, window_bounds = array<i64: 128, 1>}, {pipeline_mode = #tpu.pipeline_mode<synchronous>, transform_indices = @transform_5, window_bounds = array<i64: 1, 128>}, {transform_indices = @transform_6, window_bounds = array<i64: 128, 128>}]} {
    %c0_i32 = arith.constant 0 : i32
    %0 = arith.cmpi eq, %arg1, %c0_i32 : i32
    %1 = arith.extui %0 : i1 to i32
    %c0_i32_0 = arith.constant 0 : i32
    %2 = arith.cmpi ne, %1, %c0_i32_0 : i32
    scf.if %2 {
      %cst_14 = arith.constant 0.000000e+00 : f32
      %17 = vector.broadcast %cst_14 : f32 to vector<128x128xf32>
      %c0_15 = arith.constant 0 : index
      %c0_16 = arith.constant 0 : index
      %18 = vector.load %arg9[%c0_15, %c0_16] : memref<128x128xf32, #tpu.memory_space<vmem>>, vector<128x128xf32>
      tpu.vector_store %arg9[%c0_15, %c0_16], %17 {strides = array<i32>} : memref<128x128xf32, #tpu.memory_space<vmem>>, vector<128x128xf32>,
    } else {
    }
    %c0 = arith.constant 0 : index
    %c0_1 = arith.constant 0 : index
    %3 = vector.load %arg2[%c0, %c0_1] : memref<128x128xbf16, #tpu.memory_space<vmem>>, vector<128x128xbf16>
    %c0_2 = arith.constant 0 : index
    %c0_3 = arith.constant 0 : index
    %4 = vector.load %arg3[%c0_2, %c0_3] : memref<128x128xbf16, #tpu.memory_space<vmem>>, vector<128x128xbf16>
    %5 = arith.mulf %3, %4 : vector<128x128xbf16>
    %c0_4 = arith.constant 0 : index
    %c0_5 = arith.constant 0 : index
    %6 = vector.load %arg4[%c0_4, %c0_5] : memref<128x48xbf16, #tpu.memory_space<vmem>>, vector<128x48xbf16>
    %c0_6 = arith.constant 0 : index
    %c0_7 = arith.constant 0 : index
    %7 = vector.load %arg5[%c0_6, %c0_7] : memref<48x128xbf16, #tpu.memory_space<vmem>>, vector<48x128xbf16>
    %cst = arith.constant dense<0.000000e+00> : vector<128x128xf32>
    %8 = tpu.matmul %6, %7, %cst {dimension_numbers = #tpu.dot_dimension_numbers<[1], [0], [0], [1], [0, 0, 1, 1], [], []>} : vector<128x48xbf16>, vector<48x128xbf16>, vector<128x128xf32> -> vector<128x128xf32>
    %9 = arith.truncf %8 : vector<128x128xf32> to vector<128x128xbf16>
    %c0_8 = arith.constant 0 : index
    %c0_9 = arith.constant 0 : index
    %10 = vector.load %arg9[%c0_8, %c0_9] : memref<128x128xf32, #tpu.memory_space<vmem>>, vector<128x128xf32>
    %cst_10 = arith.constant dense<0.000000e+00> : vector<128x128xf32>
    %11 = tpu.matmul %5, %9, %cst_10 {dimension_numbers = #tpu.dot_dimension_numbers<[1], [0], [0], [1], [0, 0, 1, 1], [], []>} : vector<128x128xbf16>, vector<128x128xbf16>, vector<128x128xf32> -> vector<128x128xf32>
    %12 = arith.addf %10, %11 : vector<128x128xf32>
    %c0_11 = arith.constant 0 : index
    %c0_12 = arith.constant 0 : index
    %13 = vector.load %arg9[%c0_11, %c0_12] : memref<128x128xf32, #tpu.memory_space<vmem>>, vector<128x128xf32>
    tpu.vector_store %arg9[%c0_11, %c0_12], %12 {strides = array<i32>} : memref<128x128xf32, #tpu.memory_space<vmem>>, vector<128x128xf32>,
    %c1_i32 = arith.constant 1 : i32
    %14 = arith.cmpi eq, %arg1, %c1_i32 : i32
    %15 = arith.extui %14 : i1 to i32
    %c0_i32_13 = arith.constant 0 : i32
    %16 = arith.cmpi ne, %15, %c0_i32_13 : i32
    scf.if %16 {
      %c0_14 = arith.constant 0 : index
      %c0_15 = arith.constant 0 : index
      %17 = vector.load %arg6[%c0_14, %c0_15] : memref<128x1xf32, #tpu.memory_space<vmem>>, vector<128x1xf32>
      %cst_16 = arith.constant 9.99999996E-13 : f32
      %18 = vector.broadcast %cst_16 : f32 to vector<128x1xf32>
      %19 = arith.maximumf %17, %18 : vector<128x1xf32>
      %20 = tpu.reciprocal %19 {approx = true} : vector<128x1xf32> -> vector<128x1xf32>
      %c0_17 = arith.constant 0 : index
      %c0_18 = arith.constant 0 : index
      %21 = vector.load %arg9[%c0_17, %c0_18] : memref<128x128xf32, #tpu.memory_space<vmem>>, vector<128x128xf32>
      %22 = vector.broadcast %20 : vector<128x1xf32> to vector<128x128xf32>
      %23 = arith.mulf %21, %22 : vector<128x128xf32>
      %c0_19 = arith.constant 0 : index
      %c0_20 = arith.constant 0 : index
      %24 = vector.load %arg7[%c0_19, %c0_20] : memref<1x128xf32, #tpu.memory_space<vmem>>, vector<1x128xf32>
      %25 = vector.broadcast %24 : vector<1x128xf32> to vector<128x128xf32>
      %26 = arith.addf %23, %25 : vector<128x128xf32>
      %c0_21 = arith.constant 0 : index
      %c0_22 = arith.constant 0 : index
      %27 = vector.load %arg8[%c0_21, %c0_22] : memref<128x128xf32, #tpu.memory_space<vmem>>, vector<128x128xf32>
      tpu.vector_store %arg8[%c0_21, %c0_22], %26 {strides = array<i32>} : memref<128x128xf32, #tpu.memory_space<vmem>>, vector<128x128xf32>,
    } else {
    }
    return
  }
  func.func @transform_0(%arg0: i32, %arg1: i32) -> (i32, i32) {
    %c0_i32 = arith.constant 0 : i32
    return %arg0, %arg1 : i32, i32
  }
  func.func @transform_1(%arg0: i32, %arg1: i32) -> (i32, i32) {
    %c0_i32 = arith.constant 0 : i32
    return %arg0, %arg1 : i32, i32
  }
  func.func @transform_2(%arg0: i32, %arg1: i32) -> (i32, i32) {
    %c0_i32 = arith.constant 0 : i32
    %c0_i32_0 = arith.constant 0 : i32
    return %arg1, %c0_i32 : i32, i32
  }
  func.func @transform_3(%arg0: i32, %arg1: i32) -> (i32, i32) {
    %c0_i32 = arith.constant 0 : i32
    %c0_i32_0 = arith.constant 0 : i32
    %c0_i32_1 = arith.constant 0 : i32
    return %c0_i32, %c0_i32_0 : i32, i32
  }
  func.func @transform_4(%arg0: i32, %arg1: i32) -> (i32, i32) {
    %c0_i32 = arith.constant 0 : i32
    %c0_i32_0 = arith.constant 0 : i32
    return %arg0, %c0_i32 : i32, i32
  }
  func.func @transform_5(%arg0: i32, %arg1: i32) -> (i32, i32) {
    %c0_i32 = arith.constant 0 : i32
    %c0_i32_0 = arith.constant 0 : i32
    %c0_i32_1 = arith.constant 0 : i32
    return %c0_i32, %c0_i32_0 : i32, i32
  }
  func.func @transform_6(%arg0: i32, %arg1: i32) -> (i32, i32) {
    %c0_i32 = arith.constant 0 : i32
    %c0_i32_0 = arith.constant 0 : i32
    return %arg0, %c0_i32 : i32, i32
  }
}

</mosaic_0001>

<bundles_post_ra>
// kernel: gcn_lpa_forward.1
= control target key start
LH: loop header
LB: loop body
LE: loop exit
PB: predicated region body
PF: predicated region fallthrough
CT: control target
= control target key end

     0   :  { %s1601_s21 = smov 0   ;;  %s1603_s22 = smov 0   ;;  %s1844_s0 = inlined_call_operand.vmem [shape: bf16[256,256], index: 0, kind: input, shape index: {}]   ;;  %s1845_s1 = inlined_call_operand.vmem [shape: bf16[256,256], index: 1, kind: input, shape index: {}]   ;;  %s1846_s2 = inlined_call_operand.vmem [shape: bf16[256,48], index: 2, kind: input, shape index: {}]   ;;  %s1847_s3 = inlined_call_operand.vmem [shape: bf16[48,128], index: 3, kind: input, shape index: {}]   ;;  %s1848_s4 = inlined_call_operand.vmem [shape: f32[256,1], index: 4, kind: input, shape index: {}]   ;;  %s1849_s5 = inlined_call_operand.vmem [shape: f32[1,128], index: 5, kind: input, shape index: {}]   ;;  %s1850_s6 = inlined_call_operand.vmem [shape: f32[256,128], index: 6, kind: output, shape index: {}]  }
   0x1   :  { %s1605_s23 = smov 0   ;;  %s1607_s24 = smov 0  }
   0x2   :  { %s1609_s25 = smov 0   ;;  %s1611_s26 = smov 0  }
   0x3   :  { %s1613_s27 = smov 0  }
   0x4 LB: > { %s25_s28 = sadd.s32 1, %s1554_s25  ;;  %s28_s29 = sadd.s32 1, %s1558_s26  ;;  %s1562_s27 = sphi %s1613_s27, %s16_s27   ;;  %s1558_s26 = sphi %s1611_s26, %s1857_s26   ;;  %s1554_s25 = sphi %s1609_s25, %s1856_s25   ;;  %s1550_s24 = sphi %s1607_s24, %s1855_s24   ;;  %s1546_s23 = sphi %s1605_s23, %s1854_s23   ;;  %s1542_s22 = sphi %s1603_s22, %s1853_s22   ;;  %s1538_s21 = sphi %s1601_s21, %s1852_s21  }
   0x5   : > { %p26_p0 = scmp.ge.s32.totalorder %s25_s28, 2  ;;  %p44_p1 = scmp.ne.s32.totalorder %s1542_s22, %s1538_s21 }
   0x6   : > { %p45_p2 = scmp.eq.s32.totalorder %s1562_s27, 0  ;;  %s37_s10 = sadd.s32 1, %s1542_s22 }
   0x7   : > { %s1859_s28 = smov (%p26_p0, %s25_s28), 0  ;;  %s1861_s29 = smov (!%p26_p0, %s28_s29), %s1558_s26 }
   0x8   : > { %p1644_p3 = por %p45_p2, %p44_p1  ;;  %p30_p4 = scmp.ge.s32.totalorder %s1861_s29, 2 }
   0x9   : > { %s33_s7 = ssub.s32 %s1554_s25, %s1859_s28  ;;  %p1238_p6 = scmp.ge.s32.totalorder %s1562_s27, 4 }
   0xa   : > { %s1863_s29 = smov (%p30_p4, %s1861_s29), 0 }
   0xb   : > { %s32_s8 = ssub.s32 %s1558_s26, %s1863_s29  ;;  %224 = sbr.rel (%p1238_p6) target bundleno = 60 (0x3c), region = 24 }
   0xc   : > { %s34_s9 = sor.u32 %s33_s7, %s32_s8 }
   0xd   : > { %p35_p5 = scmp.eq.s32.totalorder %s34_s9, 0 }
   0xf   : > { %s1656_s11 = scalar_select %p35_p5, %s1542_s22, %s37_s10  }
  0x10   : > { %227 = sbr.rel (!%p1644_p3) target bundleno = 38 (0x26), region = 28  ;;  %s229_s12 = sand.u32 (%p1644_p3), 1, %s1542_s22  }
  0x11   : > { %s1312_s13 = sshll.u32 (%p1644_p3), %s1558_s26, 5  ;;  %s1239_s14 = sshll.u32 (%p1644_p3), %s229_s12, 6 }
  0x12   : > { %s234_s15 = sadd.s32 (%p1644_p3), %s1554_s25, %s1312_s13  ;;  %s231_s20 = scalar_lea.vmem (%p1644_p3), [#allocation3], %s1239_s14 }
  0x13   : > { %s1242_s16 = sshll.u32 (%p1644_p3), %s234_s15, 2 }
  0x14   : > { %s1667_s19 = scalar_lea.vmem (%p1644_p3), %s1844_s0, %s1242_s16 }
  0x15   : > { %v253_v0 = vld [vmem:[%s1667_s19] sm:$0xf]  ;;  %v255_v1 = vld [vmem:[%s1667_s19 + $0x8] sm:$0xf]  ;;  %v257_v2 = vld [vmem:[%s1667_s19 + $0x10] sm:$0xf] }
  0x16   : > { %254 = vst [vmem:[%s231_s20] sm:$0xf] %v253_v0  ;;  %v259_v3 = vld [vmem:[%s1667_s19 + $0x18] sm:$0xf]  ;;  %v261_v4 = vld [vmem:[%s1667_s19 + $0x20] sm:$0xf] }
  0x17   : > { %256 = vst [vmem:[%s231_s20 + $0x4] sm:$0xf] %v255_v1  ;;  %v263_v5 = vld [vmem:[%s1667_s19 + $0x28] sm:$0xf]  ;;  %v265_v6 = vld [vmem:[%s1667_s19 + $0x30] sm:$0xf] }
  0x18   : > { %258 = vst [vmem:[%s231_s20 + $0x8] sm:$0xf] %v257_v2  ;;  %v267_v7 = vld [vmem:[%s1667_s19 + $0x38] sm:$0xf]  ;;  %v269_v8 = vld [vmem:[%s1667_s19 + $0x40] sm:$0xf] }
  0x19   : > { %260 = vst [vmem:[%s231_s20 + $0xc] sm:$0xf] %v259_v3  ;;  %v271_v9 = vld [vmem:[%s1667_s19 + $0x48] sm:$0xf]  ;;  %v273_v10 = vld [vmem:[%s1667_s19 + $0x50] sm:$0xf] }
  0x1a   : > { %262 = vst [vmem:[%s231_s20 + $0x10] sm:$0xf] %v261_v4  ;;  %v275_v11 = vld [vmem:[%s1667_s19 + $0x58] sm:$0xf]  ;;  %v277_v12 = vld [vmem:[%s1667_s19 + $0x60] sm:$0xf] }
  0x1b   : > { %264 = vst [vmem:[%s231_s20 + $0x14] sm:$0xf] %v263_v5  ;;  %v279_v13 = vld [vmem:[%s1667_s19 + $0x68] sm:$0xf]  ;;  %v281_v14 = vld [vmem:[%s1667_s19 + $0x70] sm:$0xf] }
  0x1c   : > { %266 = vst [vmem:[%s231_s20 + $0x18] sm:$0xf] %v265_v6  ;;  %v283_v15 = vld [vmem:[%s1667_s19 + $0x78] sm:$0xf] }
  0x1d   : > { %268 = vst [vmem:[%s231_s20 + $0x1c] sm:$0xf] %v267_v7 }
  0x1e   : > { %270 = vst [vmem:[%s231_s20 + $0x20] sm:$0xf] %v269_v8 }
  0x1f   : > { %272 = vst [vmem:[%s231_s20 + $0x24] sm:$0xf] %v271_v9 }
  0x20   : > { %274 = vst [vmem:[%s231_s20 + $0x28] sm:$0xf] %v273_v10 }
  0x21   : > { %276 = vst [vmem:[%s231_s20 + $0x2c] sm:$0xf] %v275_v11 }
  0x22   : > { %278 = vst [vmem:[%s231_s20 + $0x30] sm:$0xf] %v277_v12 }
  0x23   : > { %280 = vst [vmem:[%s231_s20 + $0x34] sm:$0xf] %v279_v13 }
  0x24   : > { %282 = vst [vmem:[%s231_s20 + $0x38] sm:$0xf] %v281_v14 }
  0x25   : > { %284 = vst [vmem:[%s231_s20 + $0x3c] sm:$0xf] %v283_v15 }
  0x26 PF: > { %340 = sbr.rel (!%p1644_p3) target bundleno = 60 (0x3c), region = 69  ;;  %s342_s7 = sand.u32 (%p1644_p3), 1, %s1542_s22  }
  0x27   : > { %s1313_s8 = sshll.u32 (%p1644_p3), %s1558_s26, 5  ;;  %s1243_s9 = sshll.u32 (%p1644_p3), %s342_s7, 6 }
  0x28   : > { %s347_s10 = sadd.s32 (%p1644_p3), %s1554_s25, %s1313_s8  ;;  %s344_s30 = scalar_lea.vmem (%p1644_p3), [#allocation4], %s1243_s9 }
  0x29   : > { %s1246_s12 = sshll.u32 (%p1644_p3), %s347_s10, 2 }
  0x2a   : > { %s1693_s15 = scalar_lea.vmem (%p1644_p3), %s1845_s1, %s1246_s12 }
  0x2b   : > { %v366_v16 = vld [vmem:[%s1693_s15] sm:$0xf]  ;;  %v368_v17 = vld [vmem:[%s1693_s15 + $0x8] sm:$0xf]  ;;  %v370_v18 = vld [vmem:[%s1693_s15 + $0x10] sm:$0xf] }
  0x2c   : > { %367 = vst [vmem:[%s344_s30] sm:$0xf] %v366_v16  ;;  %v372_v19 = vld [vmem:[%s1693_s15 + $0x18] sm:$0xf]  ;;  %v374_v20 = vld [vmem:[%s1693_s15 + $0x20] sm:$0xf] }
  0x2d   : > { %369 = vst [vmem:[%s344_s30 + $0x4] sm:$0xf] %v368_v17  ;;  %v376_v21 = vld [vmem:[%s1693_s15 + $0x28] sm:$0xf]  ;;  %v378_v22 = vld [vmem:[%s1693_s15 + $0x30] sm:$0xf] }
  0x2e   : > { %371 = vst [vmem:[%s344_s30 + $0x8] sm:$0xf] %v370_v18  ;;  %v380_v23 = vld [vmem:[%s1693_s15 + $0x38] sm:$0xf]  ;;  %v382_v24 = vld [vmem:[%s1693_s15 + $0x40] sm:$0xf] }
  0x2f   : > { %373 = vst [vmem:[%s344_s30 + $0xc] sm:$0xf] %v372_v19  ;;  %v384_v25 = vld [vmem:[%s1693_s15 + $0x48] sm:$0xf]  ;;  %v386_v26 = vld [vmem:[%s1693_s15 + $0x50] sm:$0xf] }
  0x30   : > { %375 = vst [vmem:[%s344_s30 + $0x10] sm:$0xf] %v374_v20  ;;  %v388_v27 = vld [vmem:[%s1693_s15 + $0x58] sm:$0xf]  ;;  %v390_v28 = vld [vmem:[%s1693_s15 + $0x60] sm:$0xf] }
  0x31   : > { %377 = vst [vmem:[%s344_s30 + $0x14] sm:$0xf] %v376_v21  ;;  %v392_v29 = vld [vmem:[%s1693_s15 + $0x68] sm:$0xf]  ;;  %v394_v30 = vld [vmem:[%s1693_s15 + $0x70] sm:$0xf] }
  0x32   : > { %379 = vst [vmem:[%s344_s30 + $0x18] sm:$0xf] %v378_v22  ;;  %v396_v31 = vld [vmem:[%s1693_s15 + $0x78] sm:$0xf] }
  0x33   : > { %381 = vst [vmem:[%s344_s30 + $0x1c] sm:$0xf] %v380_v23 }
  0x34   : > { %383 = vst [vmem:[%s344_s30 + $0x20] sm:$0xf] %v382_v24 }
  0x35   : > { %385 = vst [vmem:[%s344_s30 + $0x24] sm:$0xf] %v384_v25 }
  0x36   : > { %387 = vst [vmem:[%s344_s30 + $0x28] sm:$0xf] %v386_v26 }
  0x37   : > { %389 = vst [vmem:[%s344_s30 + $0x2c] sm:$0xf] %v388_v27 }
  0x38   : > { %391 = vst [vmem:[%s344_s30 + $0x30] sm:$0xf] %v390_v28 }
  0x39   : > { %393 = vst [vmem:[%s344_s30 + $0x34] sm:$0xf] %v392_v29 }
  0x3a   : > { %395 = vst [vmem:[%s344_s30 + $0x38] sm:$0xf] %v394_v30 }
  0x3b   : > { %397 = vst [vmem:[%s344_s30 + $0x3c] sm:$0xf] %v396_v31 }
  0x3c PF: > { %p1247_p7 = scmp.ge.s32.totalorder %s1562_s27, 1  ;;  %p470_p8 = scmp.lt.s32.totalorder %s1562_s27, 5 }
  0x3e   : > { %p471_p9 = pnand %p1247_p7, %p470_p8 }
  0x3f   : > { %s477_s16 = sand.u32 (!%p471_p9), 1, %s1538_s21   ;;  %s1250_s17 = sshll.u32 (!%p471_p9), %s1546_s23, 4 }
  0x40   : > { %474 = sbr.rel (%p471_p9) target bundleno = 688 (0x2b0), region = 118  ;;  %s1248_s18 = sshll.u32 (!%p471_p9), %s477_s16, 6 }
  0x41   : > { %p530_p10 = scmp.lt.s32.totalorder (!%p471_p9), %s1250_s17, 31  ;;  %s1252_s19 = sshll.u32 (!%p471_p9), %s1550_s24, 4 }
  0x42   : > { %p536_p11 = scmp.lt.s32.totalorder (!%p471_p9), %s1252_s19, 31  ;;  %s1731_s24 = scalar_lea.vmem (!%p471_p9), [#allocation3], %s1248_s18 }
  0x43   : > { %s1733_s16 = scalar_lea.vmem (!%p471_p9), [#allocation4], %s1248_s18  ;;  %p1256_p12 = scmp.ne.s32.totalorder (!%p471_p9), %s1546_s23, 0 }
  0x45   : > { %s1865_s17 = smov (!%p530_p10, %s1250_s17), 31  ;;  %s1867_s19 = smov (!%p536_p11, %s1252_s19), 31 }
  0x46   : > { %s1251_s20 = sshll.u32 %s1865_s17, 2  ;;  %s1253_s10 = sshll.u32 %s1867_s19, 3 }
  0x47   : > { %s1719_s9 = scalar_lea.vmem %s1846_s2, %s1251_s20  ;;  %s1724_s14 = scalar_lea.vmem %s1848_s4, %s1253_s10 }
  0x48   : > { %s1729_s30 = scalar_lea.vmem %s1850_s6, %s1253_s10  ;;  %551 = sbr.rel (%p1256_p12) target bundleno = 94 (0x5e), region = 130 }
  0x4d   : > { %v1564_v32 = vmov 0.0  }
  0x4e   : > { %552 = vst [vmem:[#allocation2 + $0x30] sm:$0xff] %v1564_v32 }
  0x4f   : > { %553 = vst [vmem:[#allocation2] sm:$0xff] %v1564_v32 }
  0x50   : > { %554 = vst [vmem:[#allocation2 + $0x58] sm:$0xff] %v1564_v32 }
  0x51   : > { %555 = vst [vmem:[#allocation2 + $0x18] sm:$0xff] %v1564_v32 }
  0x52   : > { %556 = vst [vmem:[#allocation2 + $0x50] sm:$0xff] %v1564_v32 }
  0x53   : > { %557 = vst [vmem:[#allocation2 + $0x68] sm:$0xff] %v1564_v32 }
  0x54   : > { %558 = vst [vmem:[#allocation2 + $0x8] sm:$0xff] %v1564_v32 }
  0x55   : > { %559 = vst [vmem:[#allocation2 + $0x48] sm:$0xff] %v1564_v32 }
  0x56   : > { %560 = vst [vmem:[#allocation2 + $0x40] sm:$0xff] %v1564_v32 }
  0x57   : > { %561 = vst [vmem:[#allocation2 + $0x20] sm:$0xff] %v1564_v32 }
  0x58   : > { %562 = vst [vmem:[#allocation2 + $0x10] sm:$0xff] %v1564_v32 }
  0x59   : > { %563 = vst [vmem:[#allocation2 + $0x38] sm:$0xff] %v1564_v32 }
  0x5a   : > { %564 = vst [vmem:[#allocation2 + $0x60] sm:$0xff] %v1564_v32 }
  0x5b   : > { %565 = vst [vmem:[#allocation2 + $0x70] sm:$0xff] %v1564_v32 }
  0x5c   : > { %566 = vst [vmem:[#allocation2 + $0x78] sm:$0xff] %v1564_v32 }
  0x5d   : > { %567 = vst [vmem:[#allocation2 + $0x28] sm:$0xff] %v1564_v32 }
  0x5e PF: > { %v1324_v33 = vld [vmem:[%s1847_s3 + $0x10] sm:$0xff]  ;;  %v1323_v34 = vld [vmem:[%s1847_s3 + $0x8] sm:$0xff]  ;;  %v1322_v35 = vld [vmem:[%s1847_s3] sm:$0xff]  ;;  %vm736_vm0 = vcmask 392192   ;;  %p1309_p13 = scmp.ne.s32.totalorder %s1546_s23, 1 }
  0x5f   : > { %766 = vmatpush.bf16.msra.mxu0 %v1324_v33  ;;  %1403 = vmatpush.bf16.msra.mxu3 %v1324_v33  ;;  %v1314_v36 = vld [vmem:[%s1719_s9] sm:$0xff]  ;;  %v1319_v37 = vld [vmem:[%s1719_s9 + $0x28] sm:$0xff]  ;;  %v1320_v39 = vld [vmem:[%s1719_s9 + $0x30] sm:$0xff] }
  0x60   : > { %v1315_v38 = vld [vmem:[%s1719_s9 + $0x8] sm:$0xff]  ;;  %v1316_v40 = vld [vmem:[%s1719_s9 + $0x10] sm:$0xff]  ;;  %v1321_v41 = vld [vmem:[%s1719_s9 + $0x38] sm:$0xff] }
  0x61   : > { %v1317_v42 = vld [vmem:[%s1719_s9 + $0x18] sm:$0xff]  ;;  %v1318_v43 = vld [vmem:[%s1719_s9 + $0x20] sm:$0xff]  ;;  %v1389_v22 = vld [vmem:[%s1731_s24 + $0x8] sm:$0xff]  }
  0x62   : > { %v1326_v2 = vld [vmem:[%s1731_s24] sm:$0xff]   ;;  %v1396_v23 = vld [vmem:[%s1733_s16 + $0x8] sm:$0xff]   ;;  %v1331_v26 = vunpack.c.l.bf16 %v1389_v22  ;;  %v1332_v27 = vunpack.c.h.bf16 %v1389_v22 }
  0x63   : > { %767 = vmatpush.bf16.msra.mxu0 %v1323_v34  ;;  %1404 = vmatpush.bf16.msra.mxu3 %v1323_v34  ;;  %v1358_v3 = vld [vmem:[%s1733_s16] sm:$0xff]   ;;  %v1327_v7 = vunpack.c.l.bf16 %v1326_v2  ;;  %v1328_v8 = vunpack.c.h.bf16 %v1326_v2  ;;  %v1393_v24 = vld [vmem:[%s1731_s24 + $0x28] sm:$0xff]   ;;  %v1363_v28 = vunpack.c.l.bf16 %v1396_v23  ;;  %v1364_v29 = vunpack.c.h.bf16 %v1396_v23  ;;  %v820_v23 = vld [vmem:[#allocation2 + $0x58] sm:$0xff] }
  0x64   : > { %v1392_v4 = vld [vmem:[%s1731_s24 + $0x20] sm:$0xff]   ;;  %v1359_v9 = vunpack.c.l.bf16 %v1358_v3  ;;  %v1360_v10 = vunpack.c.h.bf16 %v1358_v3  ;;  %v1400_v25 = vld [vmem:[%s1733_s16 + $0x28] sm:$0xff]   ;;  %v1347_v30 = vunpack.c.l.bf16 %v1393_v24  ;;  %v1348_v31 = vunpack.c.h.bf16 %v1393_v24 }
  0x65   : > { %v1399_v5 = vld [vmem:[%s1733_s16 + $0x20] sm:$0xff]   ;;  %v1343_v11 = vunpack.c.l.bf16 %v1392_v4  ;;  %v1344_v12 = vunpack.c.h.bf16 %v1392_v4  ;;  %v1379_v32 = vunpack.c.l.bf16 %v1400_v25  ;;  %v1380_v33 = vunpack.c.h.bf16 %v1400_v25 }
  0x66   : > { %v1375_v13 = vunpack.c.l.bf16 %v1399_v5  ;;  %v1376_v14 = vunpack.c.h.bf16 %v1399_v5  ;;  %v632_v16 = vmul.f32 %v1359_v9, %v1327_v7  ;;  %v633_v17 = vmul.f32 %v1360_v10, %v1328_v8 }
  0x67   : > { %768 = vmatpush.bf16.msra.mxu0 %v1322_v35  ;;  %1405 = vmatpush.bf16.msra.mxu3 %v1322_v35  ;;  %v634_v34 = vmul.f32 %v1363_v28, %v1331_v26  ;;  %v635_v35 = vmul.f32 %v1364_v29, %v1332_v27  ;;  %v828_v27 = vld [vmem:[#allocation2 + $0x10] sm:$0xff]  ;;  %v821_v29 = vld [vmem:[#allocation2 + $0x18] sm:$0xff] }
  0x68   : > { %v640_v18 = vmul.f32 %v1375_v13, %v1343_v11  ;;  %v641_v19 = vmul.f32 %v1376_v14, %v1344_v12  ;;  %v648_v20 = vpack.c.bf16 %v633_v17, %v632_v16  ;;  %v818_v12 = vld [vmem:[#allocation2 + $0x30] sm:$0xff]  ;;  %v819_v17 = vld [vmem:[#allocation2] sm:$0xff] }
  0x6a   : > { %1301 = vmatmul.msk.bf16.vlgmr.msra.gmra.mxu0 %vm736_vm0, %v1314_v36  ;;  %1306 = vmatmul.msk.bf16.vlgmr.msra.gmra.mxu3 %vm736_vm0, %v1319_v37  ;;  %v652_v21 = vpack.c.bf16 %v641_v19, %v640_v18  ;;  %v642_v36 = vmul.f32 %v1379_v32, %v1347_v30  ;;  %v643_v37 = vmul.f32 %v1380_v33, %v1348_v31  ;;  %v829_v33 = vld [vmem:[#allocation2 + $0x38] sm:$0xff] }
  0x7a   : > { %1302 = vmatmul.msk.bf16.gmra.mxu0 %vm736_vm0, %v1315_v38  ;;  %1307 = vmatmul.msk.bf16.gmra.mxu3 %vm736_vm0, %v1320_v39  ;;  %v649_v38 = vpack.c.bf16 %v635_v35, %v634_v34  ;;  %v653_v39 = vpack.c.bf16 %v643_v37, %v642_v36  ;;  %v822_v35 = vld [vmem:[#allocation2 + $0x50] sm:$0xff] }
  0x8a   : > { %1303 = vmatmul.msk.bf16.gmra.mxu0 %vm736_vm0, %v1316_v40  ;;  %1308 = vmatmul.msk.bf16.gmra.mxu3 %vm736_vm0, %v1321_v41  ;;  %v1390_v40 = vld [vmem:[%s1731_s24 + $0x10] sm:$0xff]  }
  0x8b   : > { %v1397_v41 = vld [vmem:[%s1733_s16 + $0x10] sm:$0xff]  }
  0x9a   : > { %1304 = vmatmul.msk.bf16.gmra.mxu0 %vm736_vm0, %v1317_v42  ;;  %v1394_v42 = vld [vmem:[%s1731_s24 + $0x30] sm:$0xff]  }
  0xaa   : > { %1305 = vmatmul.msk.bf16.gmra.mxu0 %vm736_vm0, %v1318_v43  ;;  %v1401_v43 = vld [vmem:[%s1733_s16 + $0x30] sm:$0xff]  }
  0xe7   : > { %v770_v44 = vpop.f32.mrf.mxu0 }
  0xed   : > { %v795_v45 = vpop.f32.mrf.mxu3 }
  0xef   : > { %v772_v46 = vpop.f32.mrf.mxu0 }
  0xf0   : > { %v810_v47 = vpack.c.bf16 %v772_v46, %v770_v44  ;;  %v1335_v44 = vunpack.c.l.bf16 %v1390_v40  ;;  %v1367_v46 = vunpack.c.l.bf16 %v1397_v41 }
  0xf5   : > { %v797_v48 = vpop.f32.mrf.mxu3 }
  0xf6   : > { %v815_v60 = vpack.c.bf16 %v797_v48, %v795_v45  ;;  %v1336_v45 = vunpack.c.h.bf16 %v1390_v40  ;;  %v1351_v48 = vunpack.c.l.bf16 %v1394_v42 }
  0xf7   : > { %v775_v49 = vpop.f32.mrf.mxu0 }
  0xfd   : > { %v800_v50 = vpop.f32.mrf.mxu3 }
  0xff   : > { %v777_v51 = vpop.f32.mrf.mxu0 }
 0x100   : > { %v811_v15 = vpack.c.bf16 %v777_v51, %v775_v49  ;;  %v1352_v49 = vunpack.c.h.bf16 %v1394_v42  ;;  %v1384_v51 = vunpack.c.h.bf16 %v1401_v43 }
 0x105   : > { %v802_v52 = vpop.f32.mrf.mxu3 }
 0x106   : > { %v816_v59 = vpack.c.bf16 %v802_v52, %v800_v50  ;;  %v1383_v50 = vunpack.c.l.bf16 %v1401_v43  ;;  %v636_v52 = vmul.f32 %v1367_v46, %v1335_v44 }
 0x107   : > { %v780_v53 = vpop.f32.mrf.mxu0 }
 0x10d   : > { %v805_v54 = vpop.f32.mrf.mxu3 }
 0x10f   : > { %v782_v55 = vpop.f32.mrf.mxu0 }
 0x110   : > { %v812_v6 = vpack.c.bf16 %v782_v55, %v780_v53  ;;  %v645_v55 = vmul.f32 %v1384_v51, %v1352_v49  ;;  %v832_v51 = vld [vmem:[#allocation2 + $0x78] sm:$0xff] }
 0x115   : > { %v807_v56 = vpop.f32.mrf.mxu3 }
 0x116   : > { %v817_v57 = vpack.c.bf16 %v807_v56, %v805_v54  ;;  %v644_v54 = vmul.f32 %v1383_v50, %v1351_v48 }
 0x117   : > { %v785_v58 = vpop.f32.mrf.mxu0 }
 0x118   : > { %834 = vmatpush.bf16.msra.mxu1 %v817_v57  ;;  %1406 = vmatpush.bf16.msra.mxu2 %v817_v57  ;;  %v654_v57 = vpack.c.bf16 %v645_v55, %v644_v54 }
 0x11c   : > { %835 = vmatpush.bf16.msra.mxu1 %v816_v59  ;;  %1407 = vmatpush.bf16.msra.mxu2 %v816_v59  ;;  %v1398_v59 = vld [vmem:[%s1733_s16 + $0x18] sm:$0xff]  }
 0x11f   : > { %v787_v61 = vpop.f32.mrf.mxu0 }
 0x120   : > { %836 = vmatpush.bf16.msra.mxu1 %v815_v60  ;;  %1408 = vmatpush.bf16.msra.mxu2 %v815_v60  ;;  %v813_v1 = vpack.c.bf16 %v787_v61, %v785_v58  ;;  %v1391_v58 = vld [vmem:[%s1731_s24 + $0x18] sm:$0xff]  }
 0x121   : > { %v1395_v60 = vld [vmem:[%s1731_s24 + $0x38] sm:$0xff]  }
 0x122   : > { %v1402_v61 = vld [vmem:[%s1733_s16 + $0x38] sm:$0xff]   ;;  %v1355_v2 = vunpack.c.l.bf16 %v1395_v60  ;;  %v1356_v3 = vunpack.c.h.bf16 %v1395_v60 }
 0x123   : > { %v1387_v4 = vunpack.c.l.bf16 %v1402_v61  ;;  %v1388_v5 = vunpack.c.h.bf16 %v1402_v61 }
 0x125   : > { %v646_v8 = vmul.f32 %v1387_v4, %v1355_v2  ;;  %v647_v9 = vmul.f32 %v1388_v5, %v1356_v3 }
 0x127   : > { %v790_v62 = vpop.f32.mrf.mxu0  ;;  %v655_v11 = vpack.c.bf16 %v647_v9, %v646_v8 }
 0x12f   : > { %v792_v63 = vpop.f32.mrf.mxu0 }
 0x130   : > { %v814_v0 = vpack.c.bf16 %v792_v63, %v790_v62  ;;  %v1339_v62 = vunpack.c.l.bf16 %v1391_v58  ;;  %v1340_v63 = vunpack.c.h.bf16 %v1391_v58 }
 0x132   : > { %837 = vmatpush.bf16.msra.mxu1 %v814_v0  ;;  %1409 = vmatpush.bf16.msra.mxu2 %v814_v0  ;;  %v1371_v0 = vunpack.c.l.bf16 %v1398_v59 }
 0x136   : > { %838 = vmatpush.bf16.msra.mxu1 %v813_v1  ;;  %1410 = vmatpush.bf16.msra.mxu2 %v813_v1  ;;  %v1372_v1 = vunpack.c.h.bf16 %v1398_v59 }
 0x138   : > { %v639_v7 = vmul.f32 %v1372_v1, %v1340_v63 }
 0x13a   : > { %839 = vmatpush.bf16.msra.mxu1 %v812_v6  ;;  %1411 = vmatpush.bf16.msra.mxu2 %v812_v6  ;;  %v638_v6 = vmul.f32 %v1371_v0, %v1339_v62 }
 0x13c   : > { %v651_v10 = vpack.c.bf16 %v639_v7, %v638_v6 }
 0x13e   : > { %840 = vmatpush.bf16.msra.mxu1 %v811_v15  ;;  %1412 = vmatpush.bf16.msra.mxu2 %v811_v15  ;;  %v826_v15 = vld [vmem:[#allocation2 + $0x40] sm:$0xff] }
 0x142   : > { %841 = vmatpush.bf16.msra.mxu1 %v810_v47  ;;  %1413 = vmatpush.bf16.msra.mxu2 %v810_v47  ;;  %v1368_v47 = vunpack.c.h.bf16 %v1397_v41  ;;  %v823_v41 = vld [vmem:[#allocation2 + $0x68] sm:$0xff] }
 0x144   : > { %v637_v53 = vmul.f32 %v1368_v47, %v1336_v45  ;;  %v831_v45 = vld [vmem:[#allocation2 + $0x70] sm:$0xff]  ;;  %v824_v47 = vld [vmem:[#allocation2 + $0x8] sm:$0xff] }
 0x145   : > { %842 = vmatmul.bf16.vlgmr.msra.gmra.mxu1 %v648_v20  ;;  %862 = vmatmul.bf16.vlgmr.msra.gmra.mxu2 %v652_v21  ;;  %v827_v21 = vld [vmem:[#allocation2 + $0x20] sm:$0xff] }
 0x146   : > { %v650_v56 = vpack.c.bf16 %v637_v53, %v636_v52  ;;  %v825_v53 = vld [vmem:[#allocation2 + $0x48] sm:$0xff] }
 0x155   : > { %847 = vmatmul.bf16.gmra.mxu1 %v649_v38  ;;  %867 = vmatmul.bf16.gmra.mxu2 %v653_v39  ;;  %v830_v39 = vld [vmem:[#allocation2 + $0x60] sm:$0xff] }
 0x165   : > { %852 = vmatmul.bf16.gmra.mxu1 %v650_v56  ;;  %872 = vmatmul.bf16.gmra.mxu2 %v654_v57  ;;  %v833_v57 = vld [vmem:[#allocation2 + $0x28] sm:$0xff] }
 0x175   : > { %857 = vmatmul.bf16.gmra.mxu1 %v651_v10  ;;  %877 = vmatmul.bf16.gmra.mxu2 %v655_v11 }
 0x1c2   : > { %v843_v13 = vpop.f32.mrf.mxu1 }
 0x1c3   : > { %v883_v14 = vadd.f32 %v843_v13, %v818_v12 }
 0x1c5   : > { %899 = vst [vmem:[#allocation2 + $0x30] sm:$0xff] %v883_v14 }
 0x1c8   : > { %v863_v16 = vpop.f32.mrf.mxu2 }
 0x1c9   : > { %v891_v18 = vadd.f32 %v863_v16, %v826_v15 }
 0x1ca   : > { %v845_v19 = vpop.f32.mrf.mxu1 }
 0x1cb   : > { %907 = vst [vmem:[#allocation2 + $0x40] sm:$0xff] %v891_v18  ;;  %v884_v20 = vadd.f32 %v845_v19, %v819_v17 }
 0x1cd   : > { %900 = vst [vmem:[#allocation2] sm:$0xff] %v884_v20 }
 0x1d0   : > { %v865_v22 = vpop.f32.mrf.mxu2 }
 0x1d1   : > { %v892_v24 = vadd.f32 %v865_v22, %v827_v21 }
 0x1d2   : > { %v848_v25 = vpop.f32.mrf.mxu1 }
 0x1d3   : > { %908 = vst [vmem:[#allocation2 + $0x20] sm:$0xff] %v892_v24  ;;  %v885_v26 = vadd.f32 %v848_v25, %v820_v23 }
 0x1d5   : > { %901 = vst [vmem:[#allocation2 + $0x58] sm:$0xff] %v885_v26 }
 0x1d8   : > { %v868_v28 = vpop.f32.mrf.mxu2 }
 0x1d9   : > { %v893_v30 = vadd.f32 %v868_v28, %v828_v27 }
 0x1da   : > { %v850_v31 = vpop.f32.mrf.mxu1 }
 0x1db   : > { %909 = vst [vmem:[#allocation2 + $0x10] sm:$0xff] %v893_v30  ;;  %v886_v32 = vadd.f32 %v850_v31, %v821_v29 }
 0x1dd   : > { %902 = vst [vmem:[#allocation2 + $0x18] sm:$0xff] %v886_v32 }
 0x1e0   : > { %v870_v34 = vpop.f32.mrf.mxu2 }
 0x1e1   : > { %v894_v36 = vadd.f32 %v870_v34, %v829_v33 }
 0x1e2   : > { %v853_v37 = vpop.f32.mrf.mxu1 }
 0x1e3   : > { %910 = vst [vmem:[#allocation2 + $0x38] sm:$0xff] %v894_v36  ;;  %v887_v38 = vadd.f32 %v853_v37, %v822_v35 }
 0x1e5   : > { %903 = vst [vmem:[#allocation2 + $0x50] sm:$0xff] %v887_v38 }
 0x1e8   : > { %v873_v40 = vpop.f32.mrf.mxu2 }
 0x1e9   : > { %v895_v42 = vadd.f32 %v873_v40, %v830_v39 }
 0x1ea   : > { %v855_v43 = vpop.f32.mrf.mxu1 }
 0x1eb   : > { %911 = vst [vmem:[#allocation2 + $0x60] sm:$0xff] %v895_v42  ;;  %v888_v44 = vadd.f32 %v855_v43, %v823_v41 }
 0x1ed   : > { %904 = vst [vmem:[#allocation2 + $0x68] sm:$0xff] %v888_v44 }
 0x1f0   : > { %v875_v46 = vpop.f32.mrf.mxu2 }
 0x1f1   : > { %v896_v48 = vadd.f32 %v875_v46, %v831_v45 }
 0x1f2   : > { %v858_v49 = vpop.f32.mrf.mxu1 }
 0x1f3   : > { %912 = vst [vmem:[#allocation2 + $0x70] sm:$0xff] %v896_v48  ;;  %v889_v50 = vadd.f32 %v858_v49, %v824_v47 }
 0x1f5   : > { %905 = vst [vmem:[#allocation2 + $0x8] sm:$0xff] %v889_v50 }
 0x1f8   : > { %v878_v52 = vpop.f32.mrf.mxu2 }
 0x1f9   : > { %v897_v54 = vadd.f32 %v878_v52, %v832_v51 }
 0x1fa   : > { %v860_v55 = vpop.f32.mrf.mxu1 }
 0x1fb   : > { %913 = vst [vmem:[#allocation2 + $0x78] sm:$0xff] %v897_v54  ;;  %v890_v56 = vadd.f32 %v860_v55, %v825_v53 }
 0x1fd   : > { %906 = vst [vmem:[#allocation2 + $0x48] sm:$0xff] %v890_v56 }
 0x1ff   : > { %918 = sbr.rel (%p1309_p13) target bundleno = 688 (0x2b0), region = 134 }
 0x200   : > { %v880_v58 = vpop.f32.mrf.mxu2 }
 0x201   : > { %v898_v59 = vadd.f32 %v880_v58, %v833_v57 }
 0x203   : > { %914 = vst [vmem:[#allocation2 + $0x28] sm:$0xff] %v898_v59 }
 0x204   : > { %v923_v60 = vld [vmem:[%s1724_s14 + $0x20] sm:$0xff]  ;;  %v921_v61 = vld [vmem:[%s1724_s14 + $0x10] sm:$0xff]  ;;  %v1565_v63 = vmov 0   ;;  %v924_v3 = vld [vmem:[%s1724_s14 + $0x28] sm:$0xff] }
 0x205   : > { %v919_v62 = vld [vmem:[%s1724_s14] sm:$0xff]  ;;  %1474 = vset.pattern.permute.xlu2 %v1565_v63  ;;  %1473 = vset.pattern.permute.xlu1 %v1565_v63  ;;  %v939_v0 = vmax.f32 %v923_v60, 1e-12  ;;  %v937_v1 = vmax.f32 %v921_v61, 1e-12  ;;  %v922_v4 = vld [vmem:[%s1724_s14 + $0x18] sm:$0xff] }
 0x206   : > { %v935_v2 = vmax.f32 %v919_v62, 1e-12  ;;  %1472 = vset.pattern.permute.xlu0 %v1565_v63  ;;  %v920_v5 = vld [vmem:[%s1724_s14 + $0x8] sm:$0xff]  ;;  %v940_v6 = vmax.f32 %v924_v3, 1e-12  ;;  %v927_v11 = vld [vmem:[%s1724_s14 + $0x40] sm:$0xff] }
 0x207   : > { %1476 = vrcp.f32 %v939_v0  ;;  %v938_v7 = vmax.f32 %v922_v4, 1e-12  ;;  %v936_v8 = vmax.f32 %v920_v5, 1e-12  ;;  %v926_v13 = vld [vmem:[%s1724_s14 + $0x38] sm:$0xff]  ;;  %v925_v14 = vld [vmem:[%s1724_s14 + $0x30] sm:$0xff] }
 0x208   : > { %1478 = vrcp.f32 %v937_v1  ;;  %v943_v15 = vmax.f32 %v927_v11, 1e-12  ;;  %v942_v16 = vmax.f32 %v926_v13, 1e-12  ;;  %v941_v18 = vmax.f32 %v925_v14, 1e-12 }
 0x209   : > { %1480 = vrcp.f32 %v935_v2  ;;  %v930_v21 = vld [vmem:[%s1724_s14 + $0x58] sm:$0xff]  ;;  %v929_v22 = vld [vmem:[%s1724_s14 + $0x50] sm:$0xff]  ;;  %v928_v23 = vld [vmem:[%s1724_s14 + $0x48] sm:$0xff] }
 0x20a   : > { %1482 = vrcp.f32 %v940_v6  ;;  %v946_v24 = vmax.f32 %v930_v21, 1e-12  ;;  %v945_v25 = vmax.f32 %v929_v22, 1e-12  ;;  %v944_v27 = vmax.f32 %v928_v23, 1e-12 }
 0x20b   : > { %1484 = vrcp.f32 %v938_v7  ;;  %v933_v30 = vld [vmem:[%s1724_s14 + $0x70] sm:$0xff]  ;;  %v932_v31 = vld [vmem:[%s1724_s14 + $0x68] sm:$0xff]  ;;  %v931_v32 = vld [vmem:[%s1724_s14 + $0x60] sm:$0xff] }
 0x20c   : > { %1486 = vrcp.f32 %v936_v8  ;;  %v949_v33 = vmax.f32 %v933_v30, 1e-12  ;;  %v948_v34 = vmax.f32 %v932_v31, 1e-12  ;;  %v947_v36 = vmax.f32 %v931_v32, 1e-12 }
 0x20d   : > { %v1477_v9 = vpop.eup %1476  ;;  %1488 = vrcp.f32 %v943_v15  ;;  %v934_v39 = vld [vmem:[%s1724_s14 + $0x78] sm:$0xff]  ;;  %v971_v45 = vld [vmem:[#allocation2 + $0x50] sm:$0xff]  ;;  %v1789_v47 = vld [vmem:[%s1849_s5] ss:$0 sm:$0xff] }
 0x20e   : > { %v1479_v10 = vpop.eup %1478  ;;  %1005 = vperm.xlu2 %1474, %v1477_v9   ;;  %1490 = vrcp.f32 %v942_v16  ;;  %v950_v41 = vmax.f32 %v934_v39, 1e-12  ;;  %v972_v50 = vld [vmem:[#allocation2 + $0x68] sm:$0xff]  ;;  %v975_v54 = vld [vmem:[#allocation2 + $0x40] sm:$0xff]  ;;  %v978_v58 = vld [vmem:[#allocation2 + $0x38] sm:$0xff] }
 0x20f   : > { %v1481_v12 = vpop.eup %1480  ;;  %995 = vperm.xlu1 %1473, %v1479_v10   ;;  %1492 = vrcp.f32 %v941_v18  ;;  %v969_v59 = vld [vmem:[#allocation2 + $0x58] sm:$0xff]  ;;  %v967_v61 = vld [vmem:[#allocation2 + $0x30] sm:$0xff]  ;;  %v968_v9 = vld [vmem:[#allocation2] sm:$0xff] }
 0x210   : > { %985 = vperm.xlu0 %1472, %v1481_v12   ;;  %v1483_v17 = vpop.eup %1482  ;;  %1494 = vrcp.f32 %v946_v24  ;;  %v981_v6 = vld [vmem:[#allocation2 + $0x78] sm:$0xff]  ;;  %v974_v18 = vld [vmem:[#allocation2 + $0x48] sm:$0xff] }
 0x211   : > { %v1485_v19 = vpop.eup %1484  ;;  %1496 = vrcp.f32 %v945_v25  ;;  %v970_v7 = vld [vmem:[#allocation2 + $0x18] sm:$0xff] }
 0x212   : > { %v1487_v20 = vpop.eup %1486  ;;  %1498 = vrcp.f32 %v944_v27  ;;  %v976_v27 = vld [vmem:[#allocation2 + $0x20] sm:$0xff] }
 0x213   : > { %v1489_v26 = vpop.eup %1488  ;;  %1500 = vrcp.f32 %v949_v33 }
 0x214   : > { %v1491_v28 = vpop.eup %1490  ;;  %1502 = vrcp.f32 %v948_v34  ;;  %v980_v34 = vld [vmem:[#allocation2 + $0x70] sm:$0xff] }
 0x215   : > { %v1493_v29 = vpop.eup %1492  ;;  %1504 = vrcp.f32 %v947_v36 }
 0x216   : > { %1010 = vperm.xlu2 %1474, %v1483_v17   ;;  %v1495_v35 = vpop.eup %1494  ;;  %1506 = vrcp.f32 %v950_v41 }
 0x217   : > { %1000 = vperm.xlu1 %1473, %v1485_v19   ;;  %v1497_v37 = vpop.eup %1496  ;;  %v973_v19 = vld [vmem:[#allocation2 + $0x8] sm:$0xff] }
 0x218   : > { %990 = vperm.xlu0 %1472, %v1487_v20   ;;  %v1499_v38 = vpop.eup %1498 }
 0x219   : > { %v1501_v40 = vpop.eup %1500 }
 0x21a   : > { %v1503_v42 = vpop.eup %1502 }
 0x21b   : > { %v1505_v43 = vpop.eup %1504 }
 0x21c   : > { %v1507_v44 = vpop.eup %1506 }
 0x21e   : > { %1025 = vperm.xlu2 %1474, %v1489_v26   ;;  %v977_v26 = vld [vmem:[#allocation2 + $0x10] sm:$0xff] }
 0x21f   : > { %1020 = vperm.xlu1 %1473, %v1491_v28  }
 0x220   : > { %1015 = vperm.xlu0 %1472, %v1493_v29  }
 0x226   : > { %1040 = vperm.xlu2 %1474, %v1495_v35   ;;  %v979_v35 = vld [vmem:[#allocation2 + $0x60] sm:$0xff] }
 0x227   : > { %1035 = vperm.xlu1 %1473, %v1497_v37  }
 0x228   : > { %1030 = vperm.xlu0 %1472, %v1499_v38  }
 0x22e   : > { %1055 = vperm.xlu2 %1474, %v1501_v40  }
 0x22f   : > { %1050 = vperm.xlu1 %1473, %v1503_v42   ;;  %v982_v42 = vld [vmem:[#allocation2 + $0x28] sm:$0xff] }
 0x230   : > { %1045 = vperm.xlu0 %1472, %v1505_v43  }
 0x238   : > { %1060 = vperm.xlu0 %1472, %v1507_v44  }
 0x268   : > { %v1006_v46 = vpop.permute.xlu2 %1005 }
 0x269   : > { %v1067_v48 = vmul.f32 %v1006_v46, %v971_v45 }
 0x26b   : > { %v1087_v49 = vadd.f32 %v1789_v47, %v1067_v48 }
 0x26d   : > { %1103 = vst [vmem:[%s1729_s30 + $0x20] sm:$0xff] %v1087_v49 }
 0x270   : > { %v1011_v51 = vpop.permute.xlu2 %1010 }
 0x271   : > { %v1068_v52 = vmul.f32 %v1011_v51, %v972_v50 }
 0x273   : > { %v1088_v53 = vadd.f32 %v1789_v47, %v1068_v52 }
 0x275   : > { %1104 = vst [vmem:[%s1729_s30 + $0x28] sm:$0xff] %v1088_v53 }
 0x278   : > { %v1026_v55 = vpop.permute.xlu2 %1025 }
 0x279   : > { %v1071_v56 = vmul.f32 %v1026_v55, %v975_v54 }
 0x27b   : > { %v1091_v57 = vadd.f32 %v1789_v47, %v1071_v56 }
 0x27d   : > { %1107 = vst [vmem:[%s1729_s30 + $0x40] sm:$0xff] %v1091_v57 }
 0x280   : > { %v1041_v60 = vpop.permute.xlu2 %1040 }
 0x281   : > { %v1074_v62 = vmul.f32 %v1041_v60, %v978_v58  ;;  %v996_v63 = vpop.permute.xlu1 %995 }
 0x282   : > { %v1065_v0 = vmul.f32 %v996_v63, %v969_v59  ;;  %v986_v1 = vpop.permute.xlu0 %985 }
 0x283   : > { %v1094_v2 = vadd.f32 %v1789_v47, %v1074_v62  ;;  %v1063_v3 = vmul.f32 %v986_v1, %v967_v61 }
 0x284   : > { %v1085_v4 = vadd.f32 %v1789_v47, %v1065_v0 }
 0x285   : > { %1110 = vst [vmem:[%s1729_s30 + $0x58] sm:$0xff] %v1094_v2  ;;  %v1083_v5 = vadd.f32 %v1789_v47, %v1063_v3 }
 0x286   : > { %1101 = vst [vmem:[%s1729_s30 + $0x10] sm:$0xff] %v1085_v4 }
 0x287   : > { %1099 = vst [vmem:[%s1729_s30] sm:$0xff] %v1083_v5 }
 0x288   : > { %v1056_v8 = vpop.permute.xlu2 %1055 }
 0x289   : > { %v1077_v10 = vmul.f32 %v1056_v8, %v981_v6  ;;  %v1001_v11 = vpop.permute.xlu1 %1000 }
 0x28a   : > { %v1066_v12 = vmul.f32 %v1001_v11, %v970_v7  ;;  %v991_v13 = vpop.permute.xlu0 %990 }
 0x28b   : > { %v1097_v14 = vadd.f32 %v1789_v47, %v1077_v10  ;;  %v1064_v15 = vmul.f32 %v991_v13, %v968_v9 }
 0x28c   : > { %v1086_v16 = vadd.f32 %v1789_v47, %v1066_v12 }
 0x28d   : > { %1113 = vst [vmem:[%s1729_s30 + $0x70] sm:$0xff] %v1097_v14  ;;  %v1084_v17 = vadd.f32 %v1789_v47, %v1064_v15 }
 0x28e   : > { %1102 = vst [vmem:[%s1729_s30 + $0x18] sm:$0xff] %v1086_v16 }
 0x28f   : > { %1100 = vst [vmem:[%s1729_s30 + $0x8] sm:$0xff] %v1084_v17 }
 0x291   : > { %v1021_v20 = vpop.permute.xlu1 %1020 }
 0x292   : > { %v1070_v21 = vmul.f32 %v1021_v20, %v974_v18  ;;  %v1016_v22 = vpop.permute.xlu0 %1015 }
 0x293   : > { %v1069_v23 = vmul.f32 %v1016_v22, %v973_v19 }
 0x294   : > { %v1090_v24 = vadd.f32 %v1789_v47, %v1070_v21 }
 0x295   : > { %v1089_v25 = vadd.f32 %v1789_v47, %v1069_v23 }
 0x296   : > { %1106 = vst [vmem:[%s1729_s30 + $0x38] sm:$0xff] %v1090_v24 }
 0x297   : > { %1105 = vst [vmem:[%s1729_s30 + $0x30] sm:$0xff] %v1089_v25 }
 0x299   : > { %v1036_v28 = vpop.permute.xlu1 %1035 }
 0x29a   : > { %v1073_v29 = vmul.f32 %v1036_v28, %v977_v26  ;;  %v1031_v30 = vpop.permute.xlu0 %1030 }
 0x29b   : > { %v1072_v31 = vmul.f32 %v1031_v30, %v976_v27 }
 0x29c   : > { %v1093_v32 = vadd.f32 %v1789_v47, %v1073_v29 }
 0x29d   : > { %v1092_v33 = vadd.f32 %v1789_v47, %v1072_v31 }
 0x29e   : > { %1109 = vst [vmem:[%s1729_s30 + $0x50] sm:$0xff] %v1093_v32 }
 0x29f   : > { %1108 = vst [vmem:[%s1729_s30 + $0x48] sm:$0xff] %v1092_v33 }
 0x2a1   : > { %v1051_v36 = vpop.permute.xlu1 %1050 }
 0x2a2   : > { %v1076_v37 = vmul.f32 %v1051_v36, %v980_v34  ;;  %v1046_v38 = vpop.permute.xlu0 %1045 }
 0x2a3   : > { %v1075_v39 = vmul.f32 %v1046_v38, %v979_v35 }
 0x2a4   : > { %v1096_v40 = vadd.f32 %v1789_v47, %v1076_v37 }
 0x2a5   : > { %v1095_v41 = vadd.f32 %v1789_v47, %v1075_v39 }
 0x2a6   : > { %1112 = vst [vmem:[%s1729_s30 + $0x68] sm:$0xff] %v1096_v40 }
 0x2a7   : > { %1111 = vst [vmem:[%s1729_s30 + $0x60] sm:$0xff] %v1095_v41 }
 0x2aa   : > { %v1061_v43 = vpop.permute.xlu0 %1060 }
 0x2ab   : > { %v1078_v44 = vmul.f32 %v1061_v43, %v982_v42 }
 0x2ad   : > { %v1098_v45 = vadd.f32 %v1789_v47, %v1078_v44 }
 0x2af   : > { %1114 = vst [vmem:[%s1729_s30 + $0x78] sm:$0xff] %v1098_v45 }
 0x2b0 PF: > { %s16_s27 = sadd.s32 1, %s1562_s27   ;;  %s1852_s21 = smov %s1542_s22 }
 0x2b1   : > { %p13_p0 = scmp.ge.s32.totalorder %s16_s27, 6   ;;  %s1853_s22 = smov %s1656_s11 }
 0x2b2   : > { %s1854_s23 = smov %s1554_s25  ;;  %s1855_s24 = smov %s1558_s26 }
 0x2b3   : > { %s1856_s25 = smov %s1859_s28  ;;  %s1857_s26 = smov %s1863_s29 }
 0x2b4   :  { %15 = sbr.rel (!%p13_p0) target bundleno = 4 (0x4), region = 183 }

</bundles_post_ra>
